<compile_context>
chip_gen: v5e
topology: v5e:2x2
jax: 0.10.0
libtpu: 0.0.40
codegen_flags: <defaults>
</compile_context>

<pallas_src>
import functools

import jax
import jax.numpy as jnp
from jax.experimental import pallas as pl
from jax.experimental.pallas import tpu as pltpu


# ----------------------------------------------------------------------------
# Small helpers
# ----------------------------------------------------------------------------
def _round_up(x, m):
    return ((x + m - 1) // m) * m


def _tpu_vmem_capacity_bytes():
    """Per-core VMEM capacity; conservative (v7x) default if the query fails."""
    try:
        info = pltpu.get_tpu_info()
        for name in ("vmem_capacity_bytes", "vmem_bytes", "vmem_size_bytes"):
            v = getattr(info, name, None)
            if v:
                return int(v)
    except Exception:
        pass
    return 64 << 20  # smallest of the targeted generations (v7x, per TC)


def _collapse_weights(weights):
    """W_prod = W0 @ W1 @ ... @ W_{L-1} (tiny, exact-ish f32 matmuls)."""
    w = weights[0].astype(jnp.float32)
    for wi in weights[1:]:
        w = jnp.dot(w, wi.astype(jnp.float32),
                    precision=jax.lax.Precision.HIGHEST)
    return w


# ----------------------------------------------------------------------------
# Fused path: all L aggregations in one pallas_call, adjacency resident in VMEM
# ----------------------------------------------------------------------------
def _make_fused_kernel(num_layers, mxu_dtype):
    def kernel(adj_ref, x_ref, w_ref, o_ref):
        adj = adj_ref[...]
        # Hoisted feature transform (weights already collapsed in the wrapper).
        h = jnp.dot(x_ref[...], w_ref[...], preferred_element_type=jnp.float32)
        for _ in range(num_layers):
            rhs = h if mxu_dtype is None else h.astype(mxu_dtype)
            h = jnp.dot(adj, rhs, preferred_element_type=jnp.float32)
        o_ref[...] = h.astype(o_ref.dtype)

    return kernel


def _fused_vmem_bytes(n, f_in, f_out, op_bytes):
    """Resident-VMEM estimate (with headroom) for the fused kernel."""
    total = n * n * op_bytes                       # adjacency (dominant term)
    total += n * f_in * op_bytes                   # x
    total += f_in * f_out * op_bytes               # W_prod
    total += n * f_out * 4                         # output block (f32)
    total += 2 * n * max(f_in, f_out) * (4 + op_bytes)   # live intermediates
    return int(1.3 * total) + (2 << 20)


def _linearized_gcn_fused(x, adj, weights, *, mxu_dtype, vmem_limit_bytes):
    n, _ = x.shape
    f_out = weights[-1].shape[1]
    op_dtype = mxu_dtype if mxu_dtype is not None else x.dtype

    w_prod = _collapse_weights(weights)
    adj_in = adj.astype(op_dtype)      # cast in the wrapper so VMEM holds bf16
    x_in = x.astype(op_dtype)
    w_in = w_prod.astype(op_dtype)

    vmem_spec = pl.BlockSpec(memory_space=pltpu.MemorySpace.VMEM)
    return pl.pallas_call(
        _make_fused_kernel(len(weights), mxu_dtype),
        out_shape=jax.ShapeDtypeStruct((n, f_out), x.dtype),
        in_specs=[vmem_spec, vmem_spec, vmem_spec],
        out_specs=vmem_spec,
        compiler_params=pltpu.CompilerParams(
            vmem_limit_bytes=vmem_limit_bytes),
    )(adj_in, x_in, w_in)


# ----------------------------------------------------------------------------
# Tiled path: per-layer K-tiled aggregation, adjacency streamed from HBM
# ----------------------------------------------------------------------------
def _aggregate_kernel(adj_ref, sup_ref, o_ref, acc_ref):
    k = pl.program_id(1)

    @pl.when(k == 0)
    def _():
        acc_ref[...] = jnp.zeros_like(acc_ref)

    acc_ref[...] += jnp.dot(adj_ref[...], sup_ref[...],
                            preferred_element_type=jnp.float32)

    @pl.when(k == pl.num_programs(1) - 1)
    def _():
        o_ref[...] = acc_ref[...].astype(o_ref.dtype)


def _adj_block_spec(tile_m, tile_k, k_steps):
    idx = lambda i, k: (i, k)
    if k_steps >= 3:
        # Deeper buffering on the streamed operand keeps adj DMAs back-to-back.
        try:
            return pl.BlockSpec((tile_m, tile_k), idx,
                                pipeline_mode=pl.Buffered(3))
        except TypeError:  # older BlockSpec without pipeline_mode
            pass
    return pl.BlockSpec((tile_m, tile_k), idx)


def _aggregate_tiled(adj_p, sup_p, *, tile_m, tile_k, out_dtype,
                     vmem_limit_bytes):
    """out = adj_p @ sup_p with row-parallel, K-tiled streaming of adj."""
    n_pad = adj_p.shape[0]
    f = sup_p.shape[1]
    grid = (n_pad // tile_m, n_pad // tile_k)
    return pl.pallas_call(
        _aggregate_kernel,
        out_shape=jax.ShapeDtypeStruct((n_pad, f), out_dtype),
        grid_spec=pltpu.PrefetchScalarGridSpec(
            num_scalar_prefetch=0,
            grid=grid,
            in_specs=[
                _adj_block_spec(tile_m, tile_k, grid[1]),        # adj block
                pl.BlockSpec((tile_k, f), lambda i, k: (k, 0)),  # support slab
            ],
            out_specs=pl.BlockSpec((tile_m, f), lambda i, k: (i, 0)),
            scratch_shapes=[pltpu.VMEM((tile_m, f), jnp.float32)],
        ),
        compiler_params=pltpu.CompilerParams(
            # Row axis first and parallel -> megacore split on v7x; reduction
            # (adj-column) axis last and arbitrary.
            dimension_semantics=("parallel", "arbitrary"),
            vmem_limit_bytes=vmem_limit_bytes,
        ),
    )(adj_p, sup_p)


def _tiling_for(n, tile_m_target, tile_k_target):
    """Pick (n_pad, tile_m, tile_k) so both tiles divide n_pad exactly."""
    assert tile_m_target % 8 == 0 and tile_k_target % 128 == 0
    big, small = max(tile_m_target, tile_k_target), min(tile_m_target,
                                                        tile_k_target)
    assert big % small == 0, "tile_m / tile_k must nest (powers of two)"
    if n >= big:
        return _round_up(n, big), tile_m_target, tile_k_target
    # Small graph that was still routed here: single block in both dims.
    n_pad = _round_up(n, 128)
    return n_pad, n_pad, n_pad


def _linearized_gcn_tiled(x, adj, weights, *, mxu_dtype, tile_m, tile_k,
                          vmem_limit_bytes):
    n, _ = x.shape
    f_out = weights[-1].shape[1]
    num_layers = len(weights)
    op_dtype = mxu_dtype if mxu_dtype is not None else x.dtype

    # Feature transform hoisted out of the kernels (tiny vs. the aggregation,
    # and keeps the row-tile grid axis embarrassingly parallel).
    w_prod = _collapse_weights(weights)
    h = jnp.dot(x.astype(jnp.float32), w_prod,
                precision=jax.lax.Precision.HIGHEST)

    n_pad, tm, tk = _tiling_for(n, tile_m, tile_k)
    pad_n = n_pad - n
    # Cast adj once in the wrapper so the streamed blocks are bf16; pad the
    # node dimension up to a tile multiple (zero rows/cols are exact no-ops).
    adj_p = jnp.pad(adj, ((0, pad_n), (0, pad_n))).astype(op_dtype)
    h_p = jnp.pad(h, ((0, pad_n), (0, 0))).astype(op_dtype)

    for layer in range(num_layers):
        last = layer == num_layers - 1
        h_p = _aggregate_tiled(
            adj_p, h_p, tile_m=tm, tile_k=tk,
            out_dtype=(x.dtype if last else op_dtype),
            vmem_limit_bytes=vmem_limit_bytes)
    return h_p[:n, :f_out]


# ----------------------------------------------------------------------------
# Top-level forward (matches Linearized_GCN.forward)
# ----------------------------------------------------------------------------
def linearized_gcn_forward(x, adj_norm, weights, *, mxu_dtype=jnp.bfloat16,
                           force_tiled=False, tile_m=512, tile_k=512):
    """mxu_dtype=None -> exact f32 matmul operands; bf16 default (f32 accum)."""
    n, f_in = x.shape
    f_out = weights[-1].shape[1]
    assert adj_norm.shape == (n, n)
    assert weights[0].shape[0] == f_in

    vmem_limit = int(_tpu_vmem_capacity_bytes() * 0.45)
    op_bytes = (jnp.dtype(mxu_dtype).itemsize if mxu_dtype is not None
                else jnp.dtype(x.dtype).itemsize)

    if (not force_tiled and
            _fused_vmem_bytes(n, f_in, f_out, op_bytes) <= vmem_limit):
        return _linearized_gcn_fused(x, adj_norm, weights, mxu_dtype=mxu_dtype,
                                     vmem_limit_bytes=vmem_limit)
    return _linearized_gcn_tiled(x, adj_norm, weights, mxu_dtype=mxu_dtype,
                                 tile_m=tile_m, tile_k=tile_k,
                                 vmem_limit_bytes=vmem_limit)


# ----------------------------------------------------------------------------
# Parameter / input construction helpers (deterministic) + reference
# ----------------------------------------------------------------------------
def glorot(key, fan_in, fan_out):
    a = jnp.sqrt(6.0 / (fan_in + fan_out))
    return jax.random.uniform(key, (fan_in, fan_out), dtype=jnp.float32,
                              minval=-a, maxval=a)


def make_linearized_gcn_params(key, input_dim, hid_dim, out_dim=None,
                               num_layer=2):
    assert num_layer > 1, "please set num_layer>1"
    if out_dim is None:
        out_dim = hid_dim
    dims = [input_dim] + [hid_dim] * (num_layer - 1) + [out_dim]
    keys = jax.random.split(key, num_layer)
    return [glorot(keys[i], dims[i], dims[i + 1]) for i in range(num_layer)]


def make_normalized_adj(key, n):
    """Symmetric D^-1/2 (A + I) D^-1/2 adjacency, just for example input."""
    logits = jax.random.uniform(key, (n, n), dtype=jnp.float32)
    a = (logits > 0.9).astype(jnp.float32)
    a = jnp.maximum(a, a.T)
    a = a + jnp.eye(n, dtype=jnp.float32)
    deg = jnp.sum(a, axis=1)
    d_inv_sqrt = 1.0 / jnp.sqrt(deg)
    return a * d_inv_sqrt[:, None] * d_inv_sqrt[None, :]


def reference_forward(x, adj, weights):
    """Layer-by-layer pure-JAX reference (matches the PyTorch module)."""
    h = x.astype(jnp.float32)
    for w in weights:
        s = jnp.dot(h, w, precision=jax.lax.Precision.HIGHEST)
        h = jnp.dot(adj, s, precision=jax.lax.Precision.HIGHEST)
    return h


if __name__ == "__main__":
    key = jax.random.PRNGKey(0)
    k_x, k_adj, k_w, k_x2, k_adj2, k_w2 = jax.random.split(key, 6)

    INPUT_DIM, HID_DIM = 64, 32

    # ---- small graph: fused single-invocation path --------------------------
    N, NUM_LAYER = 128, 2
    x = jax.random.normal(k_x, (N, INPUT_DIM), dtype=jnp.float32)
    adj = make_normalized_adj(k_adj, N)
    weights = make_linearized_gcn_params(k_w, INPUT_DIM, HID_DIM,
                                         num_layer=NUM_LAYER)
    ref = reference_forward(x, adj, weights)

    fwd_f32 = jax.jit(functools.partial(linearized_gcn_forward,
                                        mxu_dtype=None))
    out = jax.block_until_ready(fwd_f32(x, adj, weights))
    assert out.shape == (N, HID_DIM)
    assert jnp.allclose(out, ref, atol=1e-3, rtol=1e-3), "fused f32 mismatch"

    fwd_bf16 = jax.jit(linearized_gcn_forward)  # default: bf16 MXU operands
    out_bf16 = jax.block_until_ready(fwd_bf16(x, adj, weights))
    assert jnp.max(jnp.abs(out_bf16 - ref)) <= \
        5e-2 * jnp.max(jnp.abs(ref)) + 1e-5, "fused bf16 mismatch"

    # ---- larger (non-multiple) graph: K-tiled streaming path (forced) -------
    N2, NUM_LAYER2 = 1000, 3
    x2 = jax.random.normal(k_x2, (N2, INPUT_DIM), dtype=jnp.float32)
    adj2 = make_normalized_adj(k_adj2, N2)
    weights2 = make_linearized_gcn_params(k_w2, INPUT_DIM, HID_DIM,
                                          num_layer=NUM_LAYER2)
    ref2 = reference_forward(x2, adj2, weights2)

    fwd_t_f32 = jax.jit(functools.partial(linearized_gcn_forward,
                                          mxu_dtype=None, force_tiled=True))
    out2 = jax.block_until_ready(fwd_t_f32(x2, adj2, weights2))
    assert out2.shape == (N2, HID_DIM)
    assert jnp.allclose(out2, ref2, atol=2e-3, rtol=2e-3), "tiled f32 mismatch"

    fwd_t_bf16 = jax.jit(functools.partial(linearized_gcn_forward,
                                           force_tiled=True))
    out2b = jax.block_until_ready(fwd_t_bf16(x2, adj2, weights2))
    assert jnp.max(jnp.abs(out2b - ref2)) <= \
        5e-2 * jnp.max(jnp.abs(ref2)) + 1e-5, "tiled bf16 mismatch"

    print("KERNEL_OK")
</pallas_src>

<mosaic_0001>
module attributes {stable_mosaic.version = 11 : i64} {
  func.func @kernel(%arg0: memref<128x128xf32, #tpu.memory_space<vmem>>, %arg1: memref<128x64xf32, #tpu.memory_space<vmem>>, %arg2: memref<64x32xf32, #tpu.memory_space<vmem>>, %arg3: memref<128x32xf32, #tpu.memory_space<vmem>>) attributes {dimension_semantics = [], scalar_prefetch = 0 : i64, scratch_operands = 0 : i64, tpu.core_type = #tpu.core_type<tc>} {
    %c0 = arith.constant 0 : index
    %c0_0 = arith.constant 0 : index
    %0 = vector.load %arg0[%c0, %c0_0] : memref<128x128xf32, #tpu.memory_space<vmem>>, vector<128x128xf32>
    %c0_1 = arith.constant 0 : index
    %c0_2 = arith.constant 0 : index
    %1 = vector.load %arg1[%c0_1, %c0_2] : memref<128x64xf32, #tpu.memory_space<vmem>>, vector<128x64xf32>
    %c0_3 = arith.constant 0 : index
    %c0_4 = arith.constant 0 : index
    %2 = vector.load %arg2[%c0_3, %c0_4] : memref<64x32xf32, #tpu.memory_space<vmem>>, vector<64x32xf32>
    %cst = arith.constant dense<0.000000e+00> : vector<128x32xf32>
    %3 = tpu.matmul %1, %2, %cst {dimension_numbers = #tpu.dot_dimension_numbers<[1], [0], [0], [1], [0, 0, 1, 1], [], []>} : vector<128x64xf32>, vector<64x32xf32>, vector<128x32xf32> -> vector<128x32xf32>
    %cst_5 = arith.constant dense<0.000000e+00> : vector<128x32xf32>
    %4 = tpu.matmul %0, %3, %cst_5 {dimension_numbers = #tpu.dot_dimension_numbers<[1], [0], [0], [1], [0, 0, 1, 1], [], []>} : vector<128x128xf32>, vector<128x32xf32>, vector<128x32xf32> -> vector<128x32xf32>
    %cst_6 = arith.constant dense<0.000000e+00> : vector<128x32xf32>
    %5 = tpu.matmul %0, %4, %cst_6 {dimension_numbers = #tpu.dot_dimension_numbers<[1], [0], [0], [1], [0, 0, 1, 1], [], []>} : vector<128x128xf32>, vector<128x32xf32>, vector<128x32xf32> -> vector<128x32xf32>
    %c0_7 = arith.constant 0 : index
    %c0_8 = arith.constant 0 : index
    %6 = vector.load %arg3[%c0_7, %c0_8] : memref<128x32xf32, #tpu.memory_space<vmem>>, vector<128x32xf32>
    tpu.vector_store %arg3[%c0_7, %c0_8], %5 {strides = array<i32>} : memref<128x32xf32, #tpu.memory_space<vmem>>, vector<128x32xf32>,
    return
  }
}

</mosaic_0001>

<bundles_post_ra>
// kernel: linearized_gcn_forward.1
= control target key start
LH: loop header
LB: loop body
LE: loop exit
PB: predicated region body
PF: predicated region fallthrough
CT: control target
= control target key end

     0   :  { %vm54_vm0 = vcmask 523264   ;;  %vm298_vm1 = vcmask 261120   ;;  %s651_s2 = inlined_call_operand.vmem [shape: f32[64,32], index: 2, kind: input, shape index: {}]   ;;  %s652_s1 = inlined_call_operand.vmem [shape: f32[128,64], index: 1, kind: input, shape index: {}]   ;;  %s653_s0 = inlined_call_operand.vmem [shape: f32[128,128], index: 0, kind: input, shape index: {}]   ;;  %s654_s3 = inlined_call_operand.vmem [shape: f32[128,32], index: 3, kind: output, shape index: {}]  }
   0x1   :  { %v53_v0 = vld [vmem:[%s651_s2 + $0x38] sm:$0xff]  ;;  %v52_v1 = vld [vmem:[%s651_s2 + $0x30] sm:$0xff]  ;;  %v51_v2 = vld [vmem:[%s651_s2 + $0x28] sm:$0xff] }
   0x2   :  { %111 = vmatpush.msra.mxu0 %v53_v0  ;;  %v50_v3 = vld [vmem:[%s651_s2 + $0x20] sm:$0xff]  ;;  %v49_v4 = vld [vmem:[%s651_s2 + $0x18] sm:$0xff]  ;;  %v48_v5 = vld [vmem:[%s651_s2 + $0x10] sm:$0xff] }
   0x3   :  { %v47_v6 = vld [vmem:[%s651_s2 + $0x8] sm:$0xff]  ;;  %v46_v7 = vld [vmem:[%s651_s2] sm:$0xff]  ;;  %v32_v10 = vld [vmem:[%s652_s1 + $0x10] sm:$0xff] }
   0x4   :  { %112 = vmatpush.msra.mxu0 %v52_v1  ;;  %v30_v8 = vld [vmem:[%s652_s1] sm:$0xff]  ;;  %v31_v9 = vld [vmem:[%s652_s1 + $0x8] sm:$0xff]  ;;  %v33_v11 = vld [vmem:[%s652_s1 + $0x18] sm:$0xff] }
   0x5   :  { %v34_v12 = vld [vmem:[%s652_s1 + $0x20] sm:$0xff]  ;;  %v35_v13 = vld [vmem:[%s652_s1 + $0x28] sm:$0xff]  ;;  %v36_v14 = vld [vmem:[%s652_s1 + $0x30] sm:$0xff] }
   0x6   :  { %113 = vmatpush.msra.mxu0 %v51_v2  ;;  %v37_v15 = vld [vmem:[%s652_s1 + $0x38] sm:$0xff]  ;;  %v38_v16 = vld [vmem:[%s652_s1 + $0x40] sm:$0xff]  ;;  %v39_v17 = vld [vmem:[%s652_s1 + $0x48] sm:$0xff] }
   0x7   :  { %v40_v18 = vld [vmem:[%s652_s1 + $0x50] sm:$0xff]  ;;  %v41_v19 = vld [vmem:[%s652_s1 + $0x58] sm:$0xff]  ;;  %v42_v20 = vld [vmem:[%s652_s1 + $0x60] sm:$0xff] }
   0x8   :  { %114 = vmatpush.msra.mxu0 %v50_v3  ;;  %v43_v21 = vld [vmem:[%s652_s1 + $0x68] sm:$0xff]  ;;  %v44_v22 = vld [vmem:[%s652_s1 + $0x70] sm:$0xff]  ;;  %v45_v23 = vld [vmem:[%s652_s1 + $0x78] sm:$0xff] }
   0x9   :  { %v478_v40 = vld [vmem:[%s653_s0] sm:$0xff]  ;;  %v490_v42 = vld [vmem:[%s653_s0 + $0x8] sm:$0xff]  ;;  %v502_v44 = vld [vmem:[%s653_s0 + $0x10] sm:$0xff] }
   0xa   :  { %115 = vmatpush.msra.mxu0 %v49_v4  ;;  %v483_v41 = vld [vmem:[%s653_s0 + $0x60] sm:$0xff]  ;;  %v495_v43 = vld [vmem:[%s653_s0 + $0x68] sm:$0xff]  ;;  %v507_v45 = vld [vmem:[%s653_s0 + $0x70] sm:$0xff] }
   0xb   :  { %v514_v46 = vld [vmem:[%s653_s0 + $0x18] sm:$0xff]  ;;  %v526_v48 = vld [vmem:[%s653_s0 + $0x20] sm:$0xff]  ;;  %v532_v49 = vld [vmem:[%s653_s0 + $0x28] sm:$0xff] }
   0xc   :  { %116 = vmatpush.msra.mxu0 %v48_v5  ;;  %v519_v47 = vld [vmem:[%s653_s0 + $0x78] sm:$0xff]  ;;  %v538_v50 = vld [vmem:[%s653_s0 + $0x30] sm:$0xff]  ;;  %v550_v52 = vld [vmem:[%s653_s0 + $0x40] sm:$0xff] }
   0xd   :  { %v544_v51 = vld [vmem:[%s653_s0 + $0x38] sm:$0xff]  ;;  %v556_v53 = vld [vmem:[%s653_s0 + $0x48] sm:$0xff]  ;;  %v562_v54 = vld [vmem:[%s653_s0 + $0x50] sm:$0xff] }
   0xe   :  { %117 = vmatpush.msra.mxu0 %v47_v6  ;;  %v568_v55 = vld [vmem:[%s653_s0 + $0x58] sm:$0xff] }
  0x10   :  { %118 = vmatpush.msra.mxu0 %v46_v7 }
  0x11   :  { %319 = vmatmul.msk.f32.vlgmr.msra.gmra.mxu0 %vm54_vm0, %v30_v8 }
  0x19   :  { %320 = vmatmul.msk.f32.gmra.mxu0 %vm54_vm0, %v31_v9 }
  0x21   :  { %321 = vmatmul.msk.f32.gmra.mxu0 %vm54_vm0, %v32_v10 }
  0x29   :  { %322 = vmatmul.msk.f32.gmra.mxu0 %vm54_vm0, %v33_v11 }
  0x31   :  { %323 = vmatmul.msk.f32.gmra.mxu0 %vm54_vm0, %v34_v12 }
  0x39   :  { %324 = vmatmul.msk.f32.gmra.mxu0 %vm54_vm0, %v35_v13 }
  0x41   :  { %325 = vmatmul.msk.f32.gmra.mxu0 %vm54_vm0, %v36_v14 }
  0x49   :  { %326 = vmatmul.msk.f32.gmra.mxu0 %vm54_vm0, %v37_v15 }
  0x51   :  { %327 = vmatmul.msk.f32.gmra.mxu0 %vm54_vm0, %v38_v16 }
  0x59   :  { %328 = vmatmul.msk.f32.gmra.mxu0 %vm54_vm0, %v39_v17 }
  0x61   :  { %329 = vmatmul.msk.f32.gmra.mxu0 %vm54_vm0, %v40_v18 }
  0x69   :  { %330 = vmatmul.msk.f32.gmra.mxu0 %vm54_vm0, %v41_v19 }
  0x71   :  { %331 = vmatmul.msk.f32.gmra.mxu0 %vm54_vm0, %v42_v20 }
  0x79   :  { %332 = vmatmul.msk.f32.gmra.mxu0 %vm54_vm0, %v43_v21 }
  0x81   :  { %333 = vmatmul.msk.f32.gmra.mxu0 %vm54_vm0, %v44_v22 }
  0x89   :  { %334 = vmatmul.msk.f32.gmra.mxu0 %vm54_vm0, %v45_v23 }
  0x8e   :  { %v120_v24 = vpop.f32.mrf.mxu0 }
  0x96   :  { %v123_v25 = vpop.f32.mrf.mxu0 }
  0x9e   :  { %v126_v26 = vpop.f32.mrf.mxu0 }
  0xa6   :  { %v129_v27 = vpop.f32.mrf.mxu0 }
  0xae   :  { %v132_v28 = vpop.f32.mrf.mxu0 }
  0xb6   :  { %v135_v29 = vpop.f32.mrf.mxu0 }
  0xbe   :  { %v138_v30 = vpop.f32.mrf.mxu0 }
  0xc6   :  { %v141_v31 = vpop.f32.mrf.mxu0 }
  0xce   :  { %v144_v32 = vpop.f32.mrf.mxu0 }
  0xd6   :  { %v147_v33 = vpop.f32.mrf.mxu0 }
  0xde   :  { %v150_v34 = vpop.f32.mrf.mxu0 }
  0xe6   :  { %v153_v35 = vpop.f32.mrf.mxu0 }
  0xee   :  { %v156_v36 = vpop.f32.mrf.mxu0 }
  0xf6   :  { %v159_v37 = vpop.f32.mrf.mxu0 }
  0xfe   :  { %v162_v38 = vpop.f32.mrf.mxu0 }
 0x106   :  { %v165_v39 = vpop.f32.mrf.mxu0 }
 0x107   :  { %168 = vmatpush.msra.mxu1 %v165_v39  ;;  %335 = vmatpush.msra.mxu3 %v165_v39 }
 0x109   :  { %169 = vmatpush.msra.mxu1 %v162_v38  ;;  %336 = vmatpush.msra.mxu3 %v162_v38 }
 0x10b   :  { %170 = vmatpush.msra.mxu1 %v159_v37  ;;  %337 = vmatpush.msra.mxu3 %v159_v37 }
 0x10d   :  { %171 = vmatpush.msra.mxu1 %v156_v36  ;;  %338 = vmatpush.msra.mxu3 %v156_v36 }
 0x10f   :  { %172 = vmatpush.msra.mxu1 %v153_v35  ;;  %339 = vmatpush.msra.mxu3 %v153_v35 }
 0x111   :  { %173 = vmatpush.msra.mxu1 %v150_v34  ;;  %340 = vmatpush.msra.mxu3 %v150_v34 }
 0x113   :  { %174 = vmatpush.msra.mxu1 %v147_v33  ;;  %341 = vmatpush.msra.mxu3 %v147_v33 }
 0x115   :  { %175 = vmatpush.msra.mxu1 %v144_v32  ;;  %342 = vmatpush.msra.mxu3 %v144_v32 }
 0x117   :  { %176 = vmatpush.msra.mxu1 %v141_v31  ;;  %343 = vmatpush.msra.mxu3 %v141_v31 }
 0x119   :  { %177 = vmatpush.msra.mxu1 %v138_v30  ;;  %344 = vmatpush.msra.mxu3 %v138_v30 }
 0x11b   :  { %178 = vmatpush.msra.mxu1 %v135_v29  ;;  %345 = vmatpush.msra.mxu3 %v135_v29 }
 0x11d   :  { %179 = vmatpush.msra.mxu1 %v132_v28  ;;  %346 = vmatpush.msra.mxu3 %v132_v28 }
 0x11f   :  { %180 = vmatpush.msra.mxu1 %v129_v27  ;;  %347 = vmatpush.msra.mxu3 %v129_v27 }
 0x121   :  { %181 = vmatpush.msra.mxu1 %v126_v26  ;;  %348 = vmatpush.msra.mxu3 %v126_v26 }
 0x123   :  { %182 = vmatpush.msra.mxu1 %v123_v25  ;;  %349 = vmatpush.msra.mxu3 %v123_v25 }
 0x125   :  { %183 = vmatpush.msra.mxu1 %v120_v24  ;;  %350 = vmatpush.msra.mxu3 %v120_v24 }
 0x126   :  { %184 = vmatmul.f32.vlgmr.msra.gmra.mxu1 %v478_v40  ;;  %220 = vmatmul.f32.vlgmr.msra.gmra.mxu3 %v483_v41 }
 0x12e   :  { %187 = vmatmul.f32.gmra.mxu1 %v490_v42  ;;  %223 = vmatmul.f32.gmra.mxu3 %v495_v43 }
 0x136   :  { %190 = vmatmul.f32.gmra.mxu1 %v502_v44  ;;  %226 = vmatmul.f32.gmra.mxu3 %v507_v45 }
 0x13e   :  { %193 = vmatmul.f32.gmra.mxu1 %v514_v46  ;;  %229 = vmatmul.f32.gmra.mxu3 %v519_v47 }
 0x146   :  { %196 = vmatmul.f32.gmra.mxu1 %v526_v48 }
 0x14e   :  { %199 = vmatmul.f32.gmra.mxu1 %v532_v49 }
 0x156   :  { %202 = vmatmul.f32.gmra.mxu1 %v538_v50 }
 0x15e   :  { %205 = vmatmul.f32.gmra.mxu1 %v544_v51 }
 0x166   :  { %208 = vmatmul.f32.gmra.mxu1 %v550_v52 }
 0x16e   :  { %211 = vmatmul.f32.gmra.mxu1 %v556_v53 }
 0x176   :  { %214 = vmatmul.f32.gmra.mxu1 %v562_v54 }
 0x17e   :  { %217 = vmatmul.f32.gmra.mxu1 %v568_v55 }
 0x1a3   :  { %v185_v56 = vpop.f32.mrf.mxu1 }
 0x1a9   :  { %v221_v57 = vpop.f32.mrf.mxu3 }
 0x1ab   :  { %v188_v58 = vpop.f32.mrf.mxu1 }
 0x1b1   :  { %v224_v59 = vpop.f32.mrf.mxu3 }
 0x1b3   :  { %v191_v60 = vpop.f32.mrf.mxu1 }
 0x1b9   :  { %v227_v61 = vpop.f32.mrf.mxu3 }
 0x1bb   :  { %v194_v62 = vpop.f32.mrf.mxu1 }
 0x1c1   :  { %v230_v63 = vpop.f32.mrf.mxu3 }
 0x1c2   :  { %233 = vmatpush.msra.mxu2 %v230_v63  ;;  %351 = vmatpush.msrb.mxu3 %v230_v63 }
 0x1c3   :  { %v197_v0 = vpop.f32.mrf.mxu1 }
 0x1c4   :  { %234 = vmatpush.msra.mxu2 %v227_v61  ;;  %352 = vmatpush.msrb.mxu3 %v227_v61 }
 0x1c6   :  { %235 = vmatpush.msra.mxu2 %v224_v59  ;;  %353 = vmatpush.msrb.mxu3 %v224_v59 }
 0x1c8   :  { %236 = vmatpush.msra.mxu2 %v221_v57  ;;  %354 = vmatpush.msrb.mxu3 %v221_v57 }
 0x1cb   :  { %v200_v1 = vpop.f32.mrf.mxu1 }
 0x1d3   :  { %v203_v2 = vpop.f32.mrf.mxu1 }
 0x1db   :  { %v206_v3 = vpop.f32.mrf.mxu1 }
 0x1e3   :  { %v209_v4 = vpop.f32.mrf.mxu1 }
 0x1eb   :  { %v212_v5 = vpop.f32.mrf.mxu1 }
 0x1f3   :  { %v215_v6 = vpop.f32.mrf.mxu1 }
 0x1fb   :  { %v218_v7 = vpop.f32.mrf.mxu1 }
 0x1fc   :  { %237 = vmatpush.msra.mxu2 %v218_v7  ;;  %355 = vmatpush.msrb.mxu3 %v218_v7 }
 0x1fe   :  { %238 = vmatpush.msra.mxu2 %v215_v6  ;;  %356 = vmatpush.msrb.mxu3 %v215_v6 }
 0x200   :  { %239 = vmatpush.msra.mxu2 %v212_v5  ;;  %357 = vmatpush.msrb.mxu3 %v212_v5 }
 0x202   :  { %240 = vmatpush.msra.mxu2 %v209_v4  ;;  %358 = vmatpush.msrb.mxu3 %v209_v4 }
 0x204   :  { %241 = vmatpush.msra.mxu2 %v206_v3  ;;  %359 = vmatpush.msrb.mxu3 %v206_v3 }
 0x206   :  { %242 = vmatpush.msra.mxu2 %v203_v2  ;;  %360 = vmatpush.msrb.mxu3 %v203_v2 }
 0x208   :  { %243 = vmatpush.msra.mxu2 %v200_v1  ;;  %361 = vmatpush.msrb.mxu3 %v200_v1 }
 0x20a   :  { %244 = vmatpush.msra.mxu2 %v197_v0  ;;  %362 = vmatpush.msrb.mxu3 %v197_v0 }
 0x20c   :  { %245 = vmatpush.msra.mxu2 %v194_v62  ;;  %363 = vmatpush.msrb.mxu3 %v194_v62 }
 0x20e   :  { %246 = vmatpush.msra.mxu2 %v191_v60  ;;  %364 = vmatpush.msrb.mxu3 %v191_v60 }
 0x210   :  { %247 = vmatpush.msra.mxu2 %v188_v58  ;;  %365 = vmatpush.msrb.mxu3 %v188_v58 }
 0x212   :  { %248 = vmatpush.msra.mxu2 %v185_v56  ;;  %366 = vmatpush.msrb.mxu3 %v185_v56 }
 0x213   :  { %249 = vmatmul.f32.vlgmr.msra.gmra.mxu2 %v478_v40  ;;  %285 = vmatmul.f32.vlgmr.msrb.gmra.mxu3 %v483_v41 }
 0x21b   :  { %252 = vmatmul.f32.gmra.mxu2 %v490_v42  ;;  %288 = vmatmul.f32.gmra.mxu3 %v495_v43 }
 0x223   :  { %255 = vmatmul.f32.gmra.mxu2 %v502_v44  ;;  %291 = vmatmul.f32.gmra.mxu3 %v507_v45 }
 0x22b   :  { %258 = vmatmul.f32.gmra.mxu2 %v514_v46  ;;  %294 = vmatmul.f32.gmra.mxu3 %v519_v47 }
 0x233   :  { %261 = vmatmul.f32.gmra.mxu2 %v526_v48 }
 0x23b   :  { %264 = vmatmul.f32.gmra.mxu2 %v532_v49 }
 0x243   :  { %267 = vmatmul.f32.gmra.mxu2 %v538_v50 }
 0x24b   :  { %270 = vmatmul.f32.gmra.mxu2 %v544_v51 }
 0x253   :  { %273 = vmatmul.f32.gmra.mxu2 %v550_v52 }
 0x25b   :  { %276 = vmatmul.f32.gmra.mxu2 %v556_v53 }
 0x263   :  { %279 = vmatmul.f32.gmra.mxu2 %v562_v54 }
 0x26b   :  { %282 = vmatmul.f32.gmra.mxu2 %v568_v55 }
 0x296   :  { %v250_v8 = vpop.f32.mrf.mxu2  ;;  %v286_v13 = vpop.f32.mrf.mxu3 }
 0x297   :  { %299 = vst.msk [vmem:[%s654_s3] sm:$0xff] %vm298_vm1, %v250_v8 }
 0x298   :  { %311 = vst.msk [vmem:[%s654_s3 + $0x60] sm:$0xff] %vm298_vm1, %v286_v13 }
 0x29e   :  { %v253_v9 = vpop.f32.mrf.mxu2  ;;  %v289_v15 = vpop.f32.mrf.mxu3 }
 0x29f   :  { %300 = vst.msk [vmem:[%s654_s3 + $0x8] sm:$0xff] %vm298_vm1, %v253_v9 }
 0x2a0   :  { %312 = vst.msk [vmem:[%s654_s3 + $0x68] sm:$0xff] %vm298_vm1, %v289_v15 }
 0x2a6   :  { %v256_v10 = vpop.f32.mrf.mxu2  ;;  %v292_v17 = vpop.f32.mrf.mxu3 }
 0x2a7   :  { %301 = vst.msk [vmem:[%s654_s3 + $0x10] sm:$0xff] %vm298_vm1, %v256_v10 }
 0x2a8   :  { %313 = vst.msk [vmem:[%s654_s3 + $0x70] sm:$0xff] %vm298_vm1, %v292_v17 }
 0x2ae   :  { %v259_v11 = vpop.f32.mrf.mxu2  ;;  %v295_v19 = vpop.f32.mrf.mxu3 }
 0x2af   :  { %302 = vst.msk [vmem:[%s654_s3 + $0x18] sm:$0xff] %vm298_vm1, %v259_v11 }
 0x2b0   :  { %314 = vst.msk [vmem:[%s654_s3 + $0x78] sm:$0xff] %vm298_vm1, %v295_v19 }
 0x2b6   :  { %v262_v12 = vpop.f32.mrf.mxu2 }
 0x2b7   :  { %303 = vst.msk [vmem:[%s654_s3 + $0x20] sm:$0xff] %vm298_vm1, %v262_v12 }
 0x2be   :  { %v265_v14 = vpop.f32.mrf.mxu2 }
 0x2bf   :  { %304 = vst.msk [vmem:[%s654_s3 + $0x28] sm:$0xff] %vm298_vm1, %v265_v14 }
 0x2c6   :  { %v268_v16 = vpop.f32.mrf.mxu2 }
 0x2c7   :  { %305 = vst.msk [vmem:[%s654_s3 + $0x30] sm:$0xff] %vm298_vm1, %v268_v16 }
 0x2ce   :  { %v271_v18 = vpop.f32.mrf.mxu2 }
 0x2cf   :  { %306 = vst.msk [vmem:[%s654_s3 + $0x38] sm:$0xff] %vm298_vm1, %v271_v18 }
 0x2d6   :  { %v274_v20 = vpop.f32.mrf.mxu2 }
 0x2d7   :  { %307 = vst.msk [vmem:[%s654_s3 + $0x40] sm:$0xff] %vm298_vm1, %v274_v20 }
 0x2de   :  { %v277_v21 = vpop.f32.mrf.mxu2 }
 0x2df   :  { %308 = vst.msk [vmem:[%s654_s3 + $0x48] sm:$0xff] %vm298_vm1, %v277_v21 }
 0x2e6   :  { %v280_v22 = vpop.f32.mrf.mxu2 }
 0x2e7   :  { %309 = vst.msk [vmem:[%s654_s3 + $0x50] sm:$0xff] %vm298_vm1, %v280_v22 }
 0x2ee   :  { %v283_v23 = vpop.f32.mrf.mxu2 }
 0x2ef   :  { %310 = vst.msk [vmem:[%s654_s3 + $0x58] sm:$0xff] %vm298_vm1, %v283_v23 }

</bundles_post_ra>
